<compile_context>
chip_gen: v6e
topology: v6e:2x2x1
jax: 0.10.0
libtpu: 0.0.40
codegen_flags: <defaults>
</compile_context>

<pallas_src>
import jax
import jax.numpy as jnp
from jax.experimental import pallas as pl
from jax.experimental.pallas import tpu as pltpu


def _bind_kernel(p_ref, z_ref, o_ref):
    """One feature block: p_ref (Ft, D), z_ref (B, Ft, D), o_ref (B, Ft, D)."""
    ft, d = p_ref.shape
    # Static unroll over the (small) per-step feature block.
    for f in range(ft):
        p_row = p_ref[pl.ds(f, 1), :]                        # (1, D)
        # Build the circulant on-chip:  W[k, n] = p[(n - k) mod D].
        # Broadcast the placeholder row over all D sublanes, then roll row k of
        # the result along lanes by k (strided roll: shift = 0 + 1 * sublane).
        w = pltpu.roll(
            jnp.broadcast_to(p_row, (d, d)), 0, 1, stride=1, stride_axis=0
        )
        zf = z_ref[:, f, :]                                   # (B, D)
        # TODO(synk): cast zf/w to bf16 on v5e/v6e/v7x when the accuracy budget
        # allows (~2-3x MXU throughput, half the DMA bytes); kept f32 here so
        # the result matches the FFT reference to 1e-4.
        o_ref[:, f, :] = jnp.dot(
            zf, w, preferred_element_type=jnp.float32
        ).astype(o_ref.dtype)


def fourier_bind(placeholders, z):
    """placeholders: (F, D) float32, z: (B, F, D) float32 -> (B, F, D) float32."""
    B, F, D = z.shape
    assert placeholders.shape == (F, D)

    # Features per grid step: fatten each step to amortize grid overhead while
    # keeping the second-minor block dim Mosaic-legal (multiple of 8, or the
    # full feature extent).
    ft = 8 if (F % 8 == 0) else F
    grid = (F // ft,)

    return pl.pallas_call(
        _bind_kernel,
        out_shape=jax.ShapeDtypeStruct((B, F, D), jnp.float32),
        grid_spec=pltpu.PrefetchScalarGridSpec(
            num_scalar_prefetch=0,
            grid=grid,
            in_specs=[
                # Raw (F, D) placeholders: only D*4 bytes per feature stream
                # in; the (D, D) circulant never exists in HBM.
                pl.BlockSpec((ft, D), lambda i: (i, 0)),
                # z stays in native (B, F, D) layout; the feature block is
                # selected by the index_map (no wrapper transposes).
                pl.BlockSpec((B, ft, D), lambda i: (0, i, 0)),
            ],
            out_specs=pl.BlockSpec((B, ft, D), lambda i: (0, i, 0)),
        ),
        compiler_params=pltpu.CompilerParams(
            dimension_semantics=("parallel",),
        ),
    )(placeholders, z)


def fourier_bind_reference(placeholders, z):
    """Pure-JAX reference: irfft(rfft(p) * rfft(z)) along the last dim."""
    p = placeholders[None, :, :]            # (1, F, D) -- the nn.Parameter
    D = z.shape[-1]
    return jnp.fft.irfft(
        jnp.fft.rfft(p, axis=-1) * jnp.fft.rfft(z, axis=-1), n=D, axis=-1
    ).astype(jnp.float32)


if __name__ == "__main__":
    key = jax.random.PRNGKey(0)
    k_p, k_z = jax.random.split(key)

    B, F, D = 4, 4, 128  # batch, n_features, latent_dim

    # Deterministic synthetic parameters (the module's __init__ just wraps the
    # given placeholders tensor of shape (n_features, latent_dim)).
    placeholders = jax.random.normal(k_p, (F, D), dtype=jnp.float32)
    z = jax.random.normal(k_z, (B, F, D), dtype=jnp.float32)

    out = fourier_bind(placeholders, z)
    out = jax.block_until_ready(out)

    ref = fourier_bind_reference(placeholders, z)
    assert out.shape == (B, F, D)
    assert jnp.allclose(out, ref, rtol=1e-4, atol=1e-4), (
        "Pallas output does not match FFT reference"
    )

    print("KERNEL_OK")
</pallas_src>

<mosaic_0001>
module attributes {stable_mosaic.version = 11 : i64} {
  func.func @_bind_kernel(%arg0: i32, %arg1: memref<4x128xf32, #tpu.memory_space<vmem>>, %arg2: memref<4x4x128xf32, #tpu.memory_space<vmem>>, %arg3: memref<4x4x128xf32, #tpu.memory_space<vmem>>) attributes {dimension_semantics = [#tpu.dimension_semantics<parallel>], iteration_bounds = array<i64: 1>, scalar_prefetch = 0 : i64, scratch_operands = 0 : i64, tpu.core_type = #tpu.core_type<tc>, window_params = [{transform_indices = @transform_0, window_bounds = array<i64: 4, 128>}, {transform_indices = @transform_1, window_bounds = array<i64: 4, 4, 128>}, {transform_indices = @transform_2, window_bounds = array<i64: 4, 4, 128>}]} {
    %c0 = arith.constant 0 : index
    %c0_0 = arith.constant 0 : index
    %0 = vector.load %arg1[%c0, %c0_0] : memref<4x128xf32, #tpu.memory_space<vmem>>, vector<1x128xf32>
    %1 = vector.shape_cast %0 : vector<1x128xf32> to vector<1x128xf32>
    %2 = vector.broadcast %1 : vector<1x128xf32> to vector<128x128xf32>
    %c0_i32 = arith.constant 0 : i32
    %3 = tpu.dynamic_rotate %2 by %c0_i32 dim 1 {stride = 1 : si32, stride_dimension = 0 : si32} : vector<128x128xf32>, i32 -> vector<128x128xf32>
    %c0_1 = arith.constant 0 : index
    %c0_2 = arith.constant 0 : index
    %c0_3 = arith.constant 0 : index
    %4 = vector.load %arg2[%c0_1, %c0_2, %c0_3] : memref<4x4x128xf32, #tpu.memory_space<vmem>>, vector<4x1x128xf32>
    %5 = vector.shape_cast %4 : vector<4x1x128xf32> to vector<4x128xf32>
    %cst = arith.constant dense<0.000000e+00> : vector<4x128xf32>
    %6 = tpu.matmul %5, %3, %cst {dimension_numbers = #tpu.dot_dimension_numbers<[1], [0], [0], [1], [0, 0, 1, 1], [], []>} : vector<4x128xf32>, vector<128x128xf32>, vector<4x128xf32> -> vector<4x128xf32>
    %c0_4 = arith.constant 0 : index
    %c0_5 = arith.constant 0 : index
    %c0_6 = arith.constant 0 : index
    %7 = vector.load %arg3[%c0_4, %c0_5, %c0_6] : memref<4x4x128xf32, #tpu.memory_space<vmem>>, vector<4x1x128xf32>
    %8 = vector.shape_cast %7 : vector<4x1x128xf32> to vector<4x128xf32>
    %9 = vector.shape_cast %6 : vector<4x128xf32> to vector<4x1x128xf32>
    tpu.vector_store %arg3[%c0_4, %c0_5, %c0_6], %9 {strides = array<i32>} : memref<4x4x128xf32, #tpu.memory_space<vmem>>, vector<4x1x128xf32>,
    %c1 = arith.constant 1 : index
    %c0_7 = arith.constant 0 : index
    %10 = vector.load %arg1[%c1, %c0_7] : memref<4x128xf32, #tpu.memory_space<vmem>>, vector<1x128xf32>
    %11 = vector.shape_cast %10 : vector<1x128xf32> to vector<1x128xf32>
    %12 = vector.broadcast %11 : vector<1x128xf32> to vector<128x128xf32>
    %c0_i32_8 = arith.constant 0 : i32
    %13 = tpu.dynamic_rotate %12 by %c0_i32_8 dim 1 {stride = 1 : si32, stride_dimension = 0 : si32} : vector<128x128xf32>, i32 -> vector<128x128xf32>
    %c0_9 = arith.constant 0 : index
    %c1_10 = arith.constant 1 : index
    %c0_11 = arith.constant 0 : index
    %14 = vector.load %arg2[%c0_9, %c1_10, %c0_11] : memref<4x4x128xf32, #tpu.memory_space<vmem>>, vector<4x1x128xf32>
    %15 = vector.shape_cast %14 : vector<4x1x128xf32> to vector<4x128xf32>
    %cst_12 = arith.constant dense<0.000000e+00> : vector<4x128xf32>
    %16 = tpu.matmul %15, %13, %cst_12 {dimension_numbers = #tpu.dot_dimension_numbers<[1], [0], [0], [1], [0, 0, 1, 1], [], []>} : vector<4x128xf32>, vector<128x128xf32>, vector<4x128xf32> -> vector<4x128xf32>
    %c0_13 = arith.constant 0 : index
    %c1_14 = arith.constant 1 : index
    %c0_15 = arith.constant 0 : index
    %17 = vector.load %arg3[%c0_13, %c1_14, %c0_15] : memref<4x4x128xf32, #tpu.memory_space<vmem>>, vector<4x1x128xf32>
    %18 = vector.shape_cast %17 : vector<4x1x128xf32> to vector<4x128xf32>
    %19 = vector.shape_cast %16 : vector<4x128xf32> to vector<4x1x128xf32>
    tpu.vector_store %arg3[%c0_13, %c1_14, %c0_15], %19 {strides = array<i32>} : memref<4x4x128xf32, #tpu.memory_space<vmem>>, vector<4x1x128xf32>,
    %c2 = arith.constant 2 : index
    %c0_16 = arith.constant 0 : index
    %20 = vector.load %arg1[%c2, %c0_16] : memref<4x128xf32, #tpu.memory_space<vmem>>, vector<1x128xf32>
    %21 = vector.shape_cast %20 : vector<1x128xf32> to vector<1x128xf32>
    %22 = vector.broadcast %21 : vector<1x128xf32> to vector<128x128xf32>
    %c0_i32_17 = arith.constant 0 : i32
    %23 = tpu.dynamic_rotate %22 by %c0_i32_17 dim 1 {stride = 1 : si32, stride_dimension = 0 : si32} : vector<128x128xf32>, i32 -> vector<128x128xf32>
    %c0_18 = arith.constant 0 : index
    %c2_19 = arith.constant 2 : index
    %c0_20 = arith.constant 0 : index
    %24 = vector.load %arg2[%c0_18, %c2_19, %c0_20] : memref<4x4x128xf32, #tpu.memory_space<vmem>>, vector<4x1x128xf32>
    %25 = vector.shape_cast %24 : vector<4x1x128xf32> to vector<4x128xf32>
    %cst_21 = arith.constant dense<0.000000e+00> : vector<4x128xf32>
    %26 = tpu.matmul %25, %23, %cst_21 {dimension_numbers = #tpu.dot_dimension_numbers<[1], [0], [0], [1], [0, 0, 1, 1], [], []>} : vector<4x128xf32>, vector<128x128xf32>, vector<4x128xf32> -> vector<4x128xf32>
    %c0_22 = arith.constant 0 : index
    %c2_23 = arith.constant 2 : index
    %c0_24 = arith.constant 0 : index
    %27 = vector.load %arg3[%c0_22, %c2_23, %c0_24] : memref<4x4x128xf32, #tpu.memory_space<vmem>>, vector<4x1x128xf32>
    %28 = vector.shape_cast %27 : vector<4x1x128xf32> to vector<4x128xf32>
    %29 = vector.shape_cast %26 : vector<4x128xf32> to vector<4x1x128xf32>
    tpu.vector_store %arg3[%c0_22, %c2_23, %c0_24], %29 {strides = array<i32>} : memref<4x4x128xf32, #tpu.memory_space<vmem>>, vector<4x1x128xf32>,
    %c3 = arith.constant 3 : index
    %c0_25 = arith.constant 0 : index
    %30 = vector.load %arg1[%c3, %c0_25] : memref<4x128xf32, #tpu.memory_space<vmem>>, vector<1x128xf32>
    %31 = vector.shape_cast %30 : vector<1x128xf32> to vector<1x128xf32>
    %32 = vector.broadcast %31 : vector<1x128xf32> to vector<128x128xf32>
    %c0_i32_26 = arith.constant 0 : i32
    %33 = tpu.dynamic_rotate %32 by %c0_i32_26 dim 1 {stride = 1 : si32, stride_dimension = 0 : si32} : vector<128x128xf32>, i32 -> vector<128x128xf32>
    %c0_27 = arith.constant 0 : index
    %c3_28 = arith.constant 3 : index
    %c0_29 = arith.constant 0 : index
    %34 = vector.load %arg2[%c0_27, %c3_28, %c0_29] : memref<4x4x128xf32, #tpu.memory_space<vmem>>, vector<4x1x128xf32>
    %35 = vector.shape_cast %34 : vector<4x1x128xf32> to vector<4x128xf32>
    %cst_30 = arith.constant dense<0.000000e+00> : vector<4x128xf32>
    %36 = tpu.matmul %35, %33, %cst_30 {dimension_numbers = #tpu.dot_dimension_numbers<[1], [0], [0], [1], [0, 0, 1, 1], [], []>} : vector<4x128xf32>, vector<128x128xf32>, vector<4x128xf32> -> vector<4x128xf32>
    %c0_31 = arith.constant 0 : index
    %c3_32 = arith.constant 3 : index
    %c0_33 = arith.constant 0 : index
    %37 = vector.load %arg3[%c0_31, %c3_32, %c0_33] : memref<4x4x128xf32, #tpu.memory_space<vmem>>, vector<4x1x128xf32>
    %38 = vector.shape_cast %37 : vector<4x1x128xf32> to vector<4x128xf32>
    %39 = vector.shape_cast %36 : vector<4x128xf32> to vector<4x1x128xf32>
    tpu.vector_store %arg3[%c0_31, %c3_32, %c0_33], %39 {strides = array<i32>} : memref<4x4x128xf32, #tpu.memory_space<vmem>>, vector<4x1x128xf32>,
    return
  }
  func.func @transform_0(%arg0: i32) -> (i32, i32) {
    %c0_i32 = arith.constant 0 : i32
    %c0_i32_0 = arith.constant 0 : i32
    return %arg0, %c0_i32 : i32, i32
  }
  func.func @transform_1(%arg0: i32) -> (i32, i32, i32) {
    %c0_i32 = arith.constant 0 : i32
    %c0_i32_0 = arith.constant 0 : i32
    %c0_i32_1 = arith.constant 0 : i32
    return %c0_i32, %arg0, %c0_i32_0 : i32, i32, i32
  }
  func.func @transform_2(%arg0: i32) -> (i32, i32, i32) {
    %c0_i32 = arith.constant 0 : i32
    %c0_i32_0 = arith.constant 0 : i32
    %c0_i32_1 = arith.constant 0 : i32
    return %c0_i32, %arg0, %c0_i32_0 : i32, i32, i32
  }
}

</mosaic_0001>

<bundles_post_ra>
// kernel: tpu_custom_call.1
= control target key start
LH: loop header
LB: loop body
LE: loop exit
PB: predicated region body
PF: predicated region fallthrough
CT: control target
= control target key end

     0   :  { %7 = vsyncpa [#allocation3], 0  ;;  %s1318_s0 = inlined_call_operand.hbm [shape: f32[4,128], index: 0, kind: input, shape index: {}]   ;;  %s1319_s1 = inlined_call_operand.hbm [shape: f32[4,4,128], index: 1, kind: input, shape index: {}]   ;;  %s1320_s2 = inlined_call_operand.hbm [shape: f32[4,4,128], index: 2, kind: output, shape index: {}]  }
   0x1   :  { %8 = vsyncpa [#allocation6], 0 }
   0x2   :  { %9 = vsyncpa [#allocation4], 0  ;;  %s1113_s9 = smov [#allocation2]   ;;  %s1114_s11 = smov [#allocation5]  }
   0x3   :  { %s16_s10 = sshll.u32 %s1113_s9, 4  ;;  %s25_s12 = sshll.u32 %s1114_s11, 4  ;;  %s17_s10 = int_to_ptr.vmem [resolvable:$true] %s16_s10  ;;  %s26_s12 = int_to_ptr.vmem [resolvable:$true] %s25_s12 }
   0x4   :  { %s1055_s13 = scalar_lea.vmem %s17_s10, 64  ;;  %p1060_p1 = scmp.lt.s32.totalorder %s17_s10, %s17_s10 }
   0x5   :  { %p1056_p0 = scmp.ne.s32.totalorder %s17_s10, %s1055_s13  ;;  %p1061_p2 = scmp.lt.s32.totalorder %s1055_s13, %s1055_s13 }
   0x7   :  { %p1062_p3 = por %p1061_p2, %p1060_p1 }
   0x9   :  { %p1063_p4 = pnand %p1062_p3, %p1056_p0 }
   0xb   :  { %1066 = shalt.err (!%p1063_p4)
}
   0xc   :  { %19 = dma.hbm_to_vmem [thread:$0]  %s1318_s0, 64, %s17_s10, [#allocation3]  }
   0xd   :  { %s1075_s16 = scalar_lea.vmem %s26_s12, 256  ;;  %p1080_p6 = scmp.lt.s32.totalorder %s26_s12, %s26_s12 }
   0xe   :  { %p1076_p5 = scmp.ne.s32.totalorder %s26_s12, %s1075_s16  ;;  %p1081_p7 = scmp.lt.s32.totalorder %s1075_s16, %s1075_s16 }
  0x10   :  { %p1082_p8 = por %p1081_p7, %p1080_p6 }
  0x12   :  { %p1083_p9 = pnand %p1082_p8, %p1076_p5 }
  0x14   :  { %1086 = shalt.err (!%p1083_p9)
}
  0x15   :  { %s1115_s17 = smov 64   ;;  %s1116_s18 = smov 4  }
  0x16   :  { %31 = dma.hbm_to_vmem [thread:$0]  %s1319_s1, 256, %s26_s12, [#allocation6], %s1115_s17, %s1115_s17, %s1116_s18  }
  0x17   :  { %1107 = dma.done.wait [#allocation3], 64  }
  0x18   :  { %1108 = vsyncadd [#allocation3], 4294967232 }
  0x19   :  { %1109 = dma.done.wait [#allocation6], 256  }
  0x1a   :  { %1110 = vsyncadd [#allocation6], 4294967040  ;;  %v1117_v0 = vmov 0.0   ;;  %v803_v1 = vld [vmem:[#allocation2] ss:$0 sm:$0xff]  ;;  %s1118_s0 = smov 368  }
  0x1b   :  { %883 = vmatprep.subr.mxu0 %v1117_v0  ;;  %918 = vmatprep.subr.mxu1 %v1117_v0  ;;  %s1119_s21 = smov 376   ;;  %v806_v2 = vld [vmem:[#allocation2 + $0x1] ss:$0 sm:$0xff]  ;;  %s1120_s1 = smov 360   ;;  %vm1131_vm0 = vmmov 0   ;;  %vm115_vm1 = vcmask 1041409  }
  0x1c   :  { %100 = vrot.lane.b32.xlu1 %v803_v1, %s1118_s0  ;;  %104 = vrot.lane.b32.xlu0 %v803_v1, %s1119_s21  ;;  %s1121_s22 = smov 352   ;;  %s1122_s23 = smov 344   ;;  %v812_v3 = vld [vmem:[#allocation2 + $0x3] ss:$0 sm:$0xff]  ;;  %v809_v4 = vld [vmem:[#allocation2 + $0x2] ss:$0 sm:$0xff] }
  0x1d   :  { %s1123_s24 = smov 336   ;;  %s1124_s25 = smov 328   ;;  %915 = vmatprep.mubr.msk.f32.mxu0 %vm1131_vm0, %v1117_v0  ;;  %950 = vmatprep.mubr.msk.f32.mxu1 %vm1131_vm0, %v1117_v0  ;;  %v482_v5 = vld [vmem:[#allocation5 + $0x6] sm:$0x1]  ;;  %v483_v6 = vld [vmem:[#allocation5 + $0xa] sm:$0x1] }
  0x1e   :  { %s1125_s26 = smov 320   ;;  %s1126_s27 = smov 312   ;;  %v489_v7 = vrot.slane %v482_v5, 7  ;;  %v481_v8 = vld [vmem:[#allocation5 + $0x2] sm:$0x1]  ;;  %v491_v10 = vrot.slane %v483_v6, 6 }
  0x1f   :  { %s1127_s28 = smov 304   ;;  %s1128_s29 = smov 296   ;;  %v484_v9 = vld [vmem:[#allocation5 + $0xe] sm:$0x1]  ;;  %vm118_vm2 = vcmask 1042434   ;;  %vm121_vm3 = vcmask 1043459  }
  0x20   :  { %289 = vrot.lane.b32.xlu1 %v806_v2, %s1118_s0  ;;  %293 = vrot.lane.b32.xlu0 %v806_v2, %s1119_s21  ;;  %s1129_s30 = smov 288   ;;  %s1130_s3 = smov 280   ;;  %v490_v11 = vsel %vm115_vm1, %v489_v7, %v481_v8  ;;  %v493_v12 = vrot.slane %v484_v9, 5  ;;  %v107_v39 = vld [vmem:[#allocation5 + $0x4] sm:$0x1] }
  0x21   :  { %s1132_s4 = smov 272   ;;  %s1133_s5 = smov 264   ;;  %v492_v13 = vsel %vm118_vm2, %v491_v10, %v490_v11  ;;  %v296_v40 = vld [vmem:[#allocation5 + $0x5] sm:$0x1]  ;;  %v108_v43 = vld [vmem:[#allocation5 + $0x8] sm:$0x1] }
  0x22   :  { %s1134_s6 = smov 256   ;;  %v1228_v14 = vsel %vm121_vm3, %v493_v12, %v492_v13  ;;  %v114_v44 = vrot.slane %v107_v39, 7  ;;  %v297_v45 = vld [vmem:[#allocation5 + $0x9] sm:$0x1]  ;;  %v303_v46 = vrot.slane %v296_v40, 7  ;;  %v117_v52 = vrot.slane %v108_v43, 6 }
  0x23   :  { %v106_v47 = vld [vmem:[#allocation5] sm:$0x1]  ;;  %v295_v48 = vld [vmem:[#allocation5 + $0x1] sm:$0x1]  ;;  %v109_v51 = vld [vmem:[#allocation5 + $0xc] sm:$0x1] }
  0x24   :  { %285 = vrot.lane.b32.xlu1 %v806_v2, %s1120_s1  ;;  %96 = vrot.lane.b32.xlu0 %v803_v1, %s1120_s1  ;;  %v298_v53 = vld [vmem:[#allocation5 + $0xd] sm:$0x1]  ;;  %v305_v54 = vrot.slane %v297_v45, 6  ;;  %v116_v55 = vsel %vm115_vm1, %v114_v44, %v106_v47  ;;  %v304_v56 = vsel %vm115_vm1, %v303_v46, %v295_v48  ;;  %v120_v59 = vrot.slane %v109_v51, 5  ;;  %s1136_s7 = smov [#allocation7]  }
  0x25   :  { %v307_v60 = vrot.slane %v298_v53, 5  ;;  %v119_v61 = vsel %vm118_vm2, %v117_v52, %v116_v55  ;;  %v1135_v47 = vmov 1966171168   ;;  %s790_s8 = sshll.u32 %s1136_s7, 4  ;;  %s791_s8 = int_to_ptr.vmem [resolvable:$true] %s790_s8 }
  0x26   :  { %v306_v62 = vsel %vm118_vm2, %v305_v54, %v304_v56  ;;  %v196_v48 = vunpack.c.l.s4 %v1135_v47  ;;  %s1087_s9 = scalar_lea.vmem %s791_s8, 256  ;;  %p1092_p11 = scmp.lt.s32.totalorder %s791_s8, %s791_s8 }
  0x27   :  { %p1088_p10 = scmp.ne.s32.totalorder %s791_s8, %s1087_s9  ;;  %p1093_p12 = scmp.lt.s32.totalorder %s1087_s9, %s1087_s9 }
  0x28   :  { %281 = vrot.lane.b32.xlu1 %v806_v2, %s1121_s22  ;;  %92 = vrot.lane.b32.xlu0 %v803_v1, %s1121_s22 }
  0x29   :  { %p1094_p13 = por %p1093_p12, %p1092_p11 }
  0x2b   :  { %p1095_p0 = pnand %p1094_p13, %p1088_p10 }
  0x2c   :  { %277 = vrot.lane.b32.xlu1 %v806_v2, %s1122_s23  ;;  %88 = vrot.lane.b32.xlu0 %v803_v1, %s1122_s23 }
  0x30   :  { %273 = vrot.lane.b32.xlu1 %v806_v2, %s1123_s24  ;;  %84 = vrot.lane.b32.xlu0 %v803_v1, %s1123_s24 }
  0x34   :  { %269 = vrot.lane.b32.xlu1 %v806_v2, %s1124_s25  ;;  %80 = vrot.lane.b32.xlu0 %v803_v1, %s1124_s25 }
  0x38   :  { %265 = vrot.lane.b32.xlu1 %v806_v2, %s1125_s26  ;;  %76 = vrot.lane.b32.xlu0 %v803_v1, %s1125_s26 }
  0x3c   :  { %261 = vrot.lane.b32.xlu1 %v806_v2, %s1126_s27  ;;  %72 = vrot.lane.b32.xlu0 %v803_v1, %s1126_s27 }
  0x40   :  { %257 = vrot.lane.b32.xlu1 %v806_v2, %s1127_s28  ;;  %68 = vrot.lane.b32.xlu0 %v803_v1, %s1127_s28 }
  0x44   :  { %253 = vrot.lane.b32.xlu1 %v806_v2, %s1128_s29  ;;  %64 = vrot.lane.b32.xlu0 %v803_v1, %s1128_s29 }
  0x48   :  { %249 = vrot.lane.b32.xlu1 %v806_v2, %s1129_s30  ;;  %60 = vrot.lane.b32.xlu0 %v803_v1, %s1129_s30 }
  0x4c   :  { %245 = vrot.lane.b32.xlu1 %v806_v2, %s1130_s3  ;;  %56 = vrot.lane.b32.xlu0 %v803_v1, %s1130_s3 }
  0x50   :  { %241 = vrot.lane.b32.xlu1 %v806_v2, %s1132_s4  ;;  %52 = vrot.lane.b32.xlu0 %v803_v1, %s1132_s4 }
  0x54   :  { %237 = vrot.lane.b32.xlu1 %v806_v2, %s1133_s5  ;;  %48 = vrot.lane.b32.xlu0 %v803_v1, %s1133_s5 }
  0x58   :  { %233 = vrot.lane.b32.xlu1 %v806_v2, %s1134_s6  ;;  %44 = vrot.lane.b32.xlu0 %v803_v1, %s1134_s6  ;;  %v122_v2 = vsel %vm121_vm3, %v120_v59, %v119_v61 }
  0x5c   :  { %665 = vrot.lane.b32.xlu1 %v812_v3, %s1119_s21  ;;  %479 = vrot.lane.b32.xlu0 %v809_v4, %s1119_s21 }
  0x60   :  { %661 = vrot.lane.b32.xlu1 %v812_v3, %s1118_s0  ;;  %475 = vrot.lane.b32.xlu0 %v809_v4, %s1118_s0 }
  0x64   :  { %657 = vrot.lane.b32.xlu1 %v812_v3, %s1120_s1  ;;  %471 = vrot.lane.b32.xlu0 %v809_v4, %s1120_s1 }
  0x68   :  { %653 = vrot.lane.b32.xlu1 %v812_v3, %s1121_s22  ;;  %467 = vrot.lane.b32.xlu0 %v809_v4, %s1121_s22 }
  0x6c   :  { %649 = vrot.lane.b32.xlu1 %v812_v3, %s1122_s23  ;;  %463 = vrot.lane.b32.xlu0 %v809_v4, %s1122_s23 }
  0x70   :  { %645 = vrot.lane.b32.xlu1 %v812_v3, %s1123_s24  ;;  %459 = vrot.lane.b32.xlu0 %v809_v4, %s1123_s24 }
  0x74   :  { %641 = vrot.lane.b32.xlu1 %v812_v3, %s1124_s25  ;;  %455 = vrot.lane.b32.xlu0 %v809_v4, %s1124_s25 }
  0x78   :  { %637 = vrot.lane.b32.xlu1 %v812_v3, %s1125_s26  ;;  %451 = vrot.lane.b32.xlu0 %v809_v4, %s1125_s26 }
  0x7c   :  { %633 = vrot.lane.b32.xlu1 %v812_v3, %s1126_s27  ;;  %447 = vrot.lane.b32.xlu0 %v809_v4, %s1126_s27 }
  0x80   :  { %629 = vrot.lane.b32.xlu1 %v812_v3, %s1127_s28  ;;  %443 = vrot.lane.b32.xlu0 %v809_v4, %s1127_s28 }
  0x84   :  { %625 = vrot.lane.b32.xlu1 %v812_v3, %s1128_s29  ;;  %439 = vrot.lane.b32.xlu0 %v809_v4, %s1128_s29 }
  0x88   :  { %621 = vrot.lane.b32.xlu1 %v812_v3, %s1129_s30  ;;  %435 = vrot.lane.b32.xlu0 %v809_v4, %s1129_s30 }
  0x8c   :  { %617 = vrot.lane.b32.xlu1 %v812_v3, %s1130_s3  ;;  %431 = vrot.lane.b32.xlu0 %v809_v4, %s1130_s3 }
  0x8e   :  { %v101_v15 = vpop.permute.xlu1 %100  ;;  %v105_v16 = vpop.permute.xlu0 %104 }
  0x8f   :  { %884 = vmatpush3.msra.mxu0 %v105_v16 }
  0x90   :  { %613 = vrot.lane.b32.xlu1 %v812_v3, %s1132_s4  ;;  %427 = vrot.lane.b32.xlu0 %v809_v4, %s1132_s4 }
  0x91   :  { %885 = vmatprep.subr.mxu0 %v1117_v0 }
  0x92   :  { %886 = vmatpush3.msra.mxu0 %v101_v15  ;;  %v290_v17 = vpop.permute.xlu1 %289  ;;  %v294_v18 = vpop.permute.xlu0 %293 }
  0x93   :  { %919 = vmatpush3.msra.mxu1 %v294_v18  ;;  %887 = vmatprep.subr.mxu0 %v1117_v0 }
  0x94   :  { %609 = vrot.lane.b32.xlu1 %v812_v3, %s1133_s5  ;;  %423 = vrot.lane.b32.xlu0 %v809_v4, %s1133_s5 }
  0x95   :  { %920 = vmatprep.subr.mxu1 %v1117_v0 }
  0x96   :  { %921 = vmatpush3.msra.mxu1 %v290_v17  ;;  %v286_v19 = vpop.permute.xlu1 %285  ;;  %v97_v20 = vpop.permute.xlu0 %96 }
  0x97   :  { %922 = vmatprep.subr.mxu1 %v1117_v0  ;;  %888 = vmatpush3.msra.mxu0 %v97_v20 }
  0x98   :  { %923 = vmatpush3.msra.mxu1 %v286_v19  ;;  %605 = vrot.lane.b32.xlu1 %v812_v3, %s1134_s6  ;;  %v308_v3 = vsel %vm121_vm3, %v307_v60, %v306_v62 }
  0x99   :  { %419 = vrot.lane.b32.xlu0 %v809_v4, %s1134_s6  ;;  %889 = vmatprep.subr.mxu0 %v1117_v0 }
  0x9a   :  { %v282_v21 = vpop.permute.xlu1 %281  ;;  %924 = vmatprep.subr.mxu1 %v1117_v0  ;;  %v93_v22 = vpop.permute.xlu0 %92 }
  0x9b   :  { %890 = vmatpush3.msra.mxu0 %v93_v22  ;;  %925 = vmatpush3.msra.mxu1 %v282_v21 }
  0x9c   :  { %891 = vmatprep.subr.mxu0 %v1117_v0  ;;  %926 = vmatprep.subr.mxu1 %v1117_v0 }
  0x9e   :  { %v278_v23 = vpop.permute.xlu1 %277  ;;  %v89_v24 = vpop.permute.xlu0 %88 }
  0x9f   :  { %892 = vmatpush3.msra.mxu0 %v89_v24  ;;  %927 = vmatpush3.msra.mxu1 %v278_v23 }
  0xa0   :  { %893 = vmatprep.subr.mxu0 %v1117_v0  ;;  %928 = vmatprep.subr.mxu1 %v1117_v0 }
  0xa2   :  { %v274_v25 = vpop.permute.xlu1 %273  ;;  %v85_v26 = vpop.permute.xlu0 %84 }
  0xa3   :  { %894 = vmatpush3.msra.mxu0 %v85_v26  ;;  %929 = vmatpush3.msra.mxu1 %v274_v25 }
  0xa4   :  { %895 = vmatprep.subr.mxu0 %v1117_v0  ;;  %930 = vmatprep.subr.mxu1 %v1117_v0 }
  0xa6   :  { %v270_v27 = vpop.permute.xlu1 %269  ;;  %v81_v28 = vpop.permute.xlu0 %80 }
  0xa7   :  { %896 = vmatpush3.msra.mxu0 %v81_v28  ;;  %931 = vmatpush3.msra.mxu1 %v270_v27 }
  0xa8   :  { %897 = vmatprep.subr.mxu0 %v1117_v0  ;;  %932 = vmatprep.subr.mxu1 %v1117_v0 }
  0xaa   :  { %v266_v29 = vpop.permute.xlu1 %265  ;;  %v77_v30 = vpop.permute.xlu0 %76 }
  0xab   :  { %898 = vmatpush3.msra.mxu0 %v77_v30  ;;  %933 = vmatpush3.msra.mxu1 %v266_v29  ;;  %v668_v29 = vld [vmem:[#allocation5 + $0x7] sm:$0x1] }
  0xac   :  { %899 = vmatprep.subr.mxu0 %v1117_v0  ;;  %934 = vmatprep.subr.mxu1 %v1117_v0 }
  0xae   :  { %v262_v31 = vpop.permute.xlu1 %261  ;;  %v73_v32 = vpop.permute.xlu0 %72 }
  0xaf   :  { %900 = vmatpush3.msra.mxu0 %v73_v32  ;;  %935 = vmatpush3.msra.mxu1 %v262_v31  ;;  %v669_v32 = vld [vmem:[#allocation5 + $0xb] sm:$0x1] }
  0xb0   :  { %901 = vmatprep.subr.mxu0 %v1117_v0  ;;  %936 = vmatprep.subr.mxu1 %v1117_v0 }
  0xb2   :  { %v258_v33 = vpop.permute.xlu1 %257  ;;  %v69_v34 = vpop.permute.xlu0 %68 }
  0xb3   :  { %902 = vmatpush3.msra.mxu0 %v69_v34  ;;  %937 = vmatpush3.msra.mxu1 %v258_v33  ;;  %v675_v33 = vrot.slane %v668_v29, 7  ;;  %v667_v34 = vld [vmem:[#allocation5 + $0x3] sm:$0x1] }
  0xb4   :  { %903 = vmatprep.subr.mxu0 %v1117_v0  ;;  %938 = vmatprep.subr.mxu1 %v1117_v0 }
  0xb5   :  { %v676_v39 = vsel %vm115_vm1, %v675_v33, %v667_v34 }
  0xb6   :  { %v254_v35 = vpop.permute.xlu1 %253  ;;  %v65_v36 = vpop.permute.xlu0 %64 }
  0xb7   :  { %904 = vmatpush3.msra.mxu0 %v65_v36  ;;  %939 = vmatpush3.msra.mxu1 %v254_v35 }
  0xb8   :  { %905 = vmatprep.subr.mxu0 %v1117_v0  ;;  %940 = vmatprep.subr.mxu1 %v1117_v0 }
  0xba   :  { %v250_v37 = vpop.permute.xlu1 %249  ;;  %v61_v38 = vpop.permute.xlu0 %60 }
  0xbb   :  { %906 = vmatpush3.msra.mxu0 %v61_v38  ;;  %941 = vmatpush3.msra.mxu1 %v250_v37  ;;  %v670_v37 = vld [vmem:[#allocation5 + $0xf] sm:$0x1]  ;;  %v677_v38 = vrot.slane %v669_v32, 6 }
  0xbc   :  { %907 = vmatprep.subr.mxu0 %v1117_v0  ;;  %942 = vmatprep.subr.mxu1 %v1117_v0  ;;  %v679_v40 = vrot.slane %v670_v37, 5 }
  0xbd   :  { %v678_v43 = vsel %vm118_vm2, %v677_v38, %v676_v39 }
  0xbe   :  { %v246_v41 = vpop.permute.xlu1 %245  ;;  %v57_v42 = vpop.permute.xlu0 %56  ;;  %v680_v44 = vsel %vm121_vm3, %v679_v40, %v678_v43 }
  0xbf   :  { %908 = vmatpush3.msra.mxu0 %v57_v42  ;;  %943 = vmatpush3.msra.mxu1 %v246_v41 }
  0xc0   :  { %909 = vmatprep.subr.mxu0 %v1117_v0  ;;  %944 = vmatprep.subr.mxu1 %v1117_v0 }
  0xc2   :  { %v242_v49 = vpop.permute.xlu1 %241  ;;  %v53_v50 = vpop.permute.xlu0 %52 }
  0xc3   :  { %910 = vmatpush3.msra.mxu0 %v53_v50  ;;  %945 = vmatpush3.msra.mxu1 %v242_v49  ;;  %v198_v49 = vlaneseq  ;;  %v197_v50 = vunpack.c.0.s8 %v196_v48 }
  0xc4   :  { %911 = vmatprep.subr.mxu0 %v1117_v0  ;;  %946 = vmatprep.subr.mxu1 %v1117_v0 }
  0xc5   :  { %v199_v51 = vshrl.u32 %v198_v49, 7 }
  0xc6   :  { %v238_v57 = vpop.permute.xlu1 %237  ;;  %v49_v58 = vpop.permute.xlu0 %48 }
  0xc7   :  { %912 = vmatpush3.msra.mxu0 %v49_v58  ;;  %947 = vmatpush3.msra.mxu1 %v238_v57  ;;  %v200_v52 = vsub.s32 %v197_v50, %v199_v51 }
  0xc8   :  { %913 = vmatprep.subr.mxu0 %v1117_v0  ;;  %948 = vmatprep.subr.mxu1 %v1117_v0 }
  0xca   :  { %v234_v63 = vpop.permute.xlu1 %233  ;;  %v45_v1 = vpop.permute.xlu0 %44 }
  0xcb   :  { %914 = vmatpush3.msra.mxu0 %v45_v1  ;;  %949 = vmatpush3.msra.mxu1 %v234_v63 }
  0xcc   :  { %953 = vmatprep.subr.mxu0 %v1117_v0  ;;  %988 = vmatprep.subr.mxu1 %v1117_v0 }
  0xcd   :  { %916 = vmatmul.mubr.f32.vlgmr.msra.gmra.mxu0 %v122_v2  ;;  %951 = vmatmul.mubr.f32.vlgmr.msra.gmra.mxu1 %v308_v3 }
  0xce   :  { %v666_v4 = vpop.permute.xlu1 %665  ;;  %v480_v5 = vpop.permute.xlu0 %479  ;;  %985 = vmatprep.mubr.msk.f32.mxu0 %vm1131_vm0, %v1117_v0  ;;  %1020 = vmatprep.mubr.msk.f32.mxu1 %vm1131_vm0, %v1117_v0 }
  0xcf   :  { %954 = vmatpush3.msra.mxu0 %v480_v5  ;;  %989 = vmatpush3.msra.mxu1 %v666_v4 }
  0xd0   :  { %955 = vmatprep.subr.mxu0 %v1117_v0  ;;  %990 = vmatprep.subr.mxu1 %v1117_v0 }
  0xd2   :  { %v662_v6 = vpop.permute.xlu1 %661  ;;  %v476_v7 = vpop.permute.xlu0 %475 }
  0xd3   :  { %956 = vmatpush3.msra.mxu0 %v476_v7  ;;  %991 = vmatpush3.msra.mxu1 %v662_v6 }
  0xd4   :  { %957 = vmatprep.subr.mxu0 %v1117_v0  ;;  %992 = vmatprep.subr.mxu1 %v1117_v0 }
  0xd6   :  { %v658_v8 = vpop.permute.xlu1 %657  ;;  %v472_v9 = vpop.permute.xlu0 %471 }
  0xd7   :  { %958 = vmatpush3.msra.mxu0 %v472_v9  ;;  %993 = vmatpush3.msra.mxu1 %v658_v8 }
  0xd8   :  { %959 = vmatprep.subr.mxu0 %v1117_v0  ;;  %994 = vmatprep.subr.mxu1 %v1117_v0 }
  0xda   :  { %v654_v10 = vpop.permute.xlu1 %653  ;;  %v468_v11 = vpop.permute.xlu0 %467 }
  0xdb   :  { %960 = vmatpush3.msra.mxu0 %v468_v11  ;;  %995 = vmatpush3.msra.mxu1 %v654_v10 }
  0xdc   :  { %961 = vmatprep.subr.mxu0 %v1117_v0  ;;  %996 = vmatprep.subr.mxu1 %v1117_v0 }
  0xde   :  { %v650_v12 = vpop.permute.xlu1 %649  ;;  %v464_v13 = vpop.permute.xlu0 %463 }
  0xdf   :  { %962 = vmatpush3.msra.mxu0 %v464_v13  ;;  %997 = vmatpush3.msra.mxu1 %v650_v12 }
  0xe0   :  { %963 = vmatprep.subr.mxu0 %v1117_v0  ;;  %998 = vmatprep.subr.mxu1 %v1117_v0 }
  0xe2   :  { %v646_v15 = vpop.permute.xlu1 %645  ;;  %v460_v16 = vpop.permute.xlu0 %459 }
  0xe3   :  { %964 = vmatpush3.msra.mxu0 %v460_v16  ;;  %999 = vmatpush3.msra.mxu1 %v646_v15 }
  0xe4   :  { %965 = vmatprep.subr.mxu0 %v1117_v0  ;;  %1000 = vmatprep.subr.mxu1 %v1117_v0 }
  0xe6   :  { %v642_v17 = vpop.permute.xlu1 %641  ;;  %v456_v18 = vpop.permute.xlu0 %455 }
  0xe7   :  { %966 = vmatpush3.msra.mxu0 %v456_v18  ;;  %1001 = vmatpush3.msra.mxu1 %v642_v17 }
  0xe8   :  { %967 = vmatprep.subr.mxu0 %v1117_v0  ;;  %1002 = vmatprep.subr.mxu1 %v1117_v0 }
  0xea   :  { %v638_v19 = vpop.permute.xlu1 %637  ;;  %v452_v20 = vpop.permute.xlu0 %451 }
  0xeb   :  { %968 = vmatpush3.msra.mxu0 %v452_v20  ;;  %1003 = vmatpush3.msra.mxu1 %v638_v19 }
  0xec   :  { %969 = vmatprep.subr.mxu0 %v1117_v0  ;;  %1004 = vmatprep.subr.mxu1 %v1117_v0 }
  0xee   :  { %v634_v21 = vpop.permute.xlu1 %633  ;;  %v448_v22 = vpop.permute.xlu0 %447 }
  0xef   :  { %970 = vmatpush3.msra.mxu0 %v448_v22  ;;  %1005 = vmatpush3.msra.mxu1 %v634_v21 }
  0xf0   :  { %971 = vmatprep.subr.mxu0 %v1117_v0  ;;  %1006 = vmatprep.subr.mxu1 %v1117_v0 }
  0xf2   :  { %v630_v23 = vpop.permute.xlu1 %629  ;;  %v444_v24 = vpop.permute.xlu0 %443 }
  0xf3   :  { %972 = vmatpush3.msra.mxu0 %v444_v24  ;;  %1007 = vmatpush3.msra.mxu1 %v630_v23 }
  0xf4   :  { %973 = vmatprep.subr.mxu0 %v1117_v0  ;;  %1008 = vmatprep.subr.mxu1 %v1117_v0 }
  0xf6   :  { %v626_v25 = vpop.permute.xlu1 %625  ;;  %v440_v26 = vpop.permute.xlu0 %439 }
  0xf7   :  { %974 = vmatpush3.msra.mxu0 %v440_v26  ;;  %1009 = vmatpush3.msra.mxu1 %v626_v25 }
  0xf8   :  { %975 = vmatprep.subr.mxu0 %v1117_v0  ;;  %1010 = vmatprep.subr.mxu1 %v1117_v0 }
  0xfa   :  { %v622_v27 = vpop.permute.xlu1 %621  ;;  %v436_v28 = vpop.permute.xlu0 %435 }
  0xfb   :  { %976 = vmatpush3.msra.mxu0 %v436_v28  ;;  %1011 = vmatpush3.msra.mxu1 %v622_v27 }
  0xfc   :  { %977 = vmatprep.subr.mxu0 %v1117_v0  ;;  %1012 = vmatprep.subr.mxu1 %v1117_v0 }
  0xfe   :  { %v618_v30 = vpop.permute.xlu1 %617  ;;  %v432_v31 = vpop.permute.xlu0 %431 }
  0xff   :  { %978 = vmatpush3.msra.mxu0 %v432_v31  ;;  %1013 = vmatpush3.msra.mxu1 %v618_v30 }
 0x100   :  { %979 = vmatprep.subr.mxu0 %v1117_v0  ;;  %1014 = vmatprep.subr.mxu1 %v1117_v0 }
 0x102   :  { %v614_v35 = vpop.permute.xlu1 %613  ;;  %v428_v36 = vpop.permute.xlu0 %427 }
 0x103   :  { %980 = vmatpush3.msra.mxu0 %v428_v36  ;;  %1015 = vmatpush3.msra.mxu1 %v614_v35 }
 0x104   :  { %981 = vmatprep.subr.mxu0 %v1117_v0  ;;  %1016 = vmatprep.subr.mxu1 %v1117_v0 }
 0x106   :  { %v610_v41 = vpop.permute.xlu1 %609  ;;  %v424_v42 = vpop.permute.xlu0 %423 }
 0x107   :  { %982 = vmatpush3.msra.mxu0 %v424_v42  ;;  %1017 = vmatpush3.msra.mxu1 %v610_v41 }
 0x108   :  { %983 = vmatprep.subr.mxu0 %v1117_v0  ;;  %1018 = vmatprep.subr.mxu1 %v1117_v0 }
 0x10a   :  { %v606_v45 = vpop.permute.xlu1 %605 }
 0x10b   :  { %v420_v46 = vpop.permute.xlu0 %419  ;;  %1019 = vmatpush3.msra.mxu1 %v606_v45 }
 0x10c   :  { %984 = vmatpush3.msra.mxu0 %v420_v46  ;;  %1021 = vmatmul.mubr.f32.vlgmr.msra.gmra.mxu1 %v680_v44 }
 0x10d   :  { %986 = vmatmul.mubr.f32.vlgmr.msra.gmra.mxu0 %v1228_v14 }
 0x18d   :  { %v190_v53 = vpop.f32.mrf.mxu0  ;;  %v376_v54 = vpop.f32.mrf.mxu1 }
 0x18e   :  { %v201_v55 = vrot.slane %v190_v53, %v200_v52  ;;  %v387_v56 = vrot.slane %v376_v54, %v200_v52 }
 0x18f   :  { %v917_v0 = vpop.f32.mrf.mxu0  ;;  %v952_v57 = vpop.f32.mrf.mxu1 }
 0x190   :  { %v202_v58 = vcombine.high %v201_v55, %v201_v55  ;;  %v209_v59 = vrot.slane %v201_v55, %v200_v52  ;;  %804 = vst.sshfl [vmem:[#allocation7] sm:$0x1 pattern:$0x73625140] %v201_v55  ;;  %v388_v60 = vcombine.high %v387_v56, %v387_v56  ;;  %v395_v61 = vrot.slane %v387_v56, %v200_v52 }
 0x191   :  { %807 = vst.sshfl [vmem:[#allocation7 + $0x1] sm:$0x1 pattern:$0x73625140] %v387_v56 }
 0x192   :  { %v216_v62 = vrot.slane %v202_v58, %v200_v52  ;;  %v217_v14 = vcombine.high %v209_v59, %v209_v59  ;;  %805 = vst.sshfl [vmem:[#allocation7 + $0x4] sm:$0x1 pattern:$0x73625140] %v202_v58  ;;  %v402_v63 = vrot.slane %v388_v60, %v200_v52  ;;  %v403_v1 = vcombine.high %v395_v61, %v395_v61 }
 0x193   :  { %808 = vst.sshfl [vmem:[#allocation7 + $0x5] sm:$0x1 pattern:$0x73625140] %v388_v60 }
 0x194   :  { %v218_v2 = vcombine.high %v216_v62, %v216_v62  ;;  %225 = vst [vmem:[#allocation7 + $0x8] sm:$0x1] %v217_v14  ;;  %v404_v3 = vcombine.high %v402_v63, %v402_v63  ;;  %411 = vst [vmem:[#allocation7 + $0x9] sm:$0x1] %v403_v1 }
 0x196   :  { %226 = vst [vmem:[#allocation7 + $0xc] sm:$0x1] %v218_v2  ;;  %412 = vst [vmem:[#allocation7 + $0xd] sm:$0x1] %v404_v3 }
 0x1cc   :  { %v748_v4 = vpop.f32.mrf.mxu1 }
 0x1cd   :  { %v562_v5 = vpop.f32.mrf.mxu0  ;;  %v759_v6 = vrot.slane %v748_v4, %v200_v52 }
 0x1ce   :  { %v573_v7 = vrot.slane %v562_v5, %v200_v52  ;;  %v1022_v8 = vpop.f32.mrf.mxu1 }
 0x1cf   :  { %v760_v9 = vcombine.high %v759_v6, %v759_v6  ;;  %v767_v10 = vrot.slane %v759_v6, %v200_v52  ;;  %813 = vst.sshfl [vmem:[#allocation7 + $0x3] sm:$0x1 pattern:$0x73625140] %v759_v6  ;;  %v987_v11 = vpop.f32.mrf.mxu0 }
 0x1d0   :  { %v574_v12 = vcombine.high %v573_v7, %v573_v7  ;;  %v581_v13 = vrot.slane %v573_v7, %v200_v52  ;;  %810 = vst.sshfl [vmem:[#allocation7 + $0x2] sm:$0x1 pattern:$0x73625140] %v573_v7 }
 0x1d1   :  { %v774_v15 = vrot.slane %v760_v9, %v200_v52  ;;  %v775_v16 = vcombine.high %v767_v10, %v767_v10  ;;  %814 = vst.sshfl [vmem:[#allocation7 + $0x7] sm:$0x1 pattern:$0x73625140] %v760_v9 }
 0x1d2   :  { %v588_v17 = vrot.slane %v574_v12, %v200_v52  ;;  %v589_v18 = vcombine.high %v581_v13, %v581_v13  ;;  %811 = vst.sshfl [vmem:[#allocation7 + $0x6] sm:$0x1 pattern:$0x73625140] %v574_v12 }
 0x1d3   :  { %v776_v19 = vcombine.high %v774_v15, %v774_v15  ;;  %783 = vst [vmem:[#allocation7 + $0xb] sm:$0x1] %v775_v16 }
 0x1d4   :  { %v590_v20 = vcombine.high %v588_v17, %v588_v17  ;;  %597 = vst [vmem:[#allocation7 + $0xa] sm:$0x1] %v589_v18 }
 0x1d5   :  { %784 = vst [vmem:[#allocation7 + $0xf] sm:$0x1] %v776_v19 }
 0x1d6   :  { %598 = vst [vmem:[#allocation7 + $0xe] sm:$0x1] %v590_v20 }
 0x1d7   :  { %1098 = shalt.err (!%p1095_p0)
}
 0x1d8   :  { %796 = dma.vmem_to_hbm [thread:$0]  %s791_s8, 256, %s1320_s2, [#allocation4], %s1115_s17, %s1115_s17, %s1116_s18  }
 0x1d9   :  { %1111 = dma.done.wait [#allocation4], 256  }
 0x1da   :  { %1112 = vsyncadd [#allocation4], 4294967040 }
 0x1db   :  { %800 = vsyncpa [#allocation3], 1 }
 0x1dc   :  { %801 = vsyncpa [#allocation6], 1 }
 0x1dd   :  { %802 = vsyncpa [#allocation4], 1 }

</bundles_post_ra>
